<compile_context>
chip_gen: v7x
topology: tpu7x:2x2x1
jax: 0.10.0
libtpu: 0.0.40
codegen_flags: <defaults>
</compile_context>

<pallas_src>
import functools

import jax
import jax.numpy as jnp
from jax import lax
from jax.experimental import pallas as pl
from jax.experimental.pallas import tpu as pltpu


def mlp1_kernel(x_ref, w1_ref, b1_ref, w2_ref, b2_ref, o_ref, *, x_transposed):
    # x_ref:  (IN, TM) if x_transposed else (TM, IN)
    # w1_ref: (HID, IN)  first-layer weight (torch layout, used directly)
    # b1_ref: (HID, 1)   first-layer bias as a column
    # w2_ref: (HID, 1)   second-layer weight as a column
    # b2_ref: (1,)       second-layer bias scalar, in SMEM
    # o_ref:  (1, TM)    lane-dense output row
    if x_transposed:
        # h = W1 @ x^T directly from the (IN, TM) block: batch stays on lanes.
        h = jnp.dot(w1_ref[...], x_ref[...], preferred_element_type=jnp.float32)
    else:
        # Contract the IN axis of both operands -> (HID, TM).
        h = lax.dot_general(
            w1_ref[...], x_ref[...],
            dimension_numbers=(((1,), (1,)), ((), ())),
            preferred_element_type=jnp.float32,
        )
    h = jnp.tanh(h + b1_ref[...])                          # (HID, TM), EUP tanh
    # TODO(synk): if a bundle dump shows the EUP slot binding on v6e/v7x, do the
    # tanh in bf16 (keep f32 bias add / reduce); keep f32 on v5e (no bf16 EUP).
    # Second layer: VPU multiply + sublane reduction; result is already a
    # lane-dense (1, TM) row and the MXU stays free.
    y = jnp.sum(h * w2_ref[...], axis=0, keepdims=True)    # (1, TM)
    o_ref[...] = (y + b2_ref[0]).astype(o_ref.dtype)


def _round_up(v, m):
    return (v + m - 1) // m * m


def _tpu_vmem_and_cores():
    """Best-effort query of VMEM capacity and TensorCore count.

    Falls back to the most restrictive assumptions (v7x: 64 MiB per TC,
    2 TensorCores) if the query is unavailable, so the chosen tiling is always
    safe."""
    vmem = None
    cores = None
    try:
        info = pltpu.get_tpu_info()
        for name in ("vmem_capacity_bytes", "vmem_bytes", "vmem_size_bytes"):
            v = getattr(info, name, None)
            if isinstance(v, int) and v > 0:
                vmem = v
                break
        for name in ("num_tensorcores", "num_cores", "tensorcore_count",
                     "cores_per_chip"):
            c = getattr(info, name, None)
            if isinstance(c, int) and c > 0:
                cores = c
                break
    except Exception:
        pass
    if vmem is None:
        vmem = 64 * 1024 * 1024   # v7x per-TC VMEM: most restrictive
    if cores is None:
        cores = 2                 # assume multi-core so the grid stays splittable
    return vmem, cores


def _choose_tile_m(n, in_f, hid, vmem_budget_bytes, *, x_transposed,
                   min_grid=1, max_tile=32768):
    """Largest tile_m that (a) divides n, (b) is a multiple of 128, (c) keeps
    at least `min_grid` grid steps, and (d) fits the VMEM budget with proper
    lane/sublane padding accounting (double-buffered x/out blocks, 2x resident
    W1/b1/W2, (hid, tile_m) f32 intermediates)."""
    if n <= 128 or n % 128 != 0:
        # Small or awkward batch: a single full-batch block is always legal.
        return n
    limit = min(n // max(min_grid, 1), max_tile, n)
    in_f_lane = _round_up(in_f, 128)
    in_f_sub = _round_up(in_f, 8)
    hid_sub = _round_up(hid, 8)
    best = None
    t = 128
    while t <= limit:
        if n % t == 0:
            t_lane = _round_up(t, 128)
            if x_transposed:
                x_blk = in_f_sub * t_lane              # (in_f, t), padded
            else:
                x_blk = _round_up(t, 8) * in_f_lane    # (t, in_f), padded
            out_blk = 8 * t_lane                       # (1, t) row -> 8 sublanes
            w1_res = 2 * hid_sub * in_f_lane           # resident W1, budget 2x
            cols = 2 * 2 * hid_sub * 128               # b1 + W2 columns, 2x each
            interm = 2 * hid_sub * t_lane              # h + elementwise temps
            per_step = 4 * (2 * x_blk + 2 * out_blk + w1_res + cols + interm)
            if per_step <= vmem_budget_bytes:
                best = t
        t += 128
    return best if best is not None else 128


def mlp1_forward(x, w1, b1, w2, b2, *, tile_m=None):
    """x: (N, input_size) float32.
    w1: (hidden, input_size), b1: (hidden,)   -- torch nn.Linear layout
    w2: (1, hidden),          b2: (1,)
    Returns (N, 1) float32.
    """
    x = jnp.asarray(x, jnp.float32)
    N, in_f = x.shape
    hid = w1.shape[0]

    # Generation-aware budgets.
    vmem_phys, n_cores = _tpu_vmem_and_cores()
    if vmem_phys >= 96 * 1024 * 1024:          # v5e / v6e: 128 MiB VMEM
        vmem_limit = 100 * 1024 * 1024
        budget = 84 * 1024 * 1024
    else:                                       # v7x (64 MiB per TC) or unknown
        vmem_limit = 48 * 1024 * 1024
        budget = 40 * 1024 * 1024

    # Batch-on-lane layout for the streamed operand when features are narrow.
    x_transposed = in_f < 128

    if tile_m is None:
        tile_m = _choose_tile_m(N, in_f, hid, budget,
                                x_transposed=x_transposed,
                                min_grid=2 if n_cores >= 2 else 1)
    assert N % tile_m == 0, "tile_m must divide N"
    assert tile_m == N or tile_m % 128 == 0, (
        "tile_m must be a multiple of 128 (or the full batch) so every "
        "BlockSpec satisfies the (8,128) rule")

    # Parameters: W1 in torch layout; W2/b1 as columns; b2 as SMEM scalar.
    w1_r = jnp.asarray(w1, jnp.float32)                    # (hid, in_f)
    b1_c = jnp.asarray(b1, jnp.float32).reshape(hid, 1)    # (hid, 1)
    w2_c = jnp.asarray(w2, jnp.float32).reshape(hid, 1)    # (hid, 1)
    b2_s = jnp.asarray(b2, jnp.float32).reshape(1)         # (1,)
    # TODO(synk): optionally cast x/W1 to bf16 (f32 accumulate) to halve the
    # streamed HBM bytes if the accuracy budget allows.

    if x_transposed:
        x_in = x.T                                          # (in_f, N), one-time
        x_block = (in_f, tile_m)
        x_index = lambda i: (0, i)
    else:
        x_in = x
        x_block = (tile_m, in_f)
        x_index = lambda i: (i, 0)

    n_steps = N // tile_m
    x_payload_bytes = 4 * tile_m * in_f
    if n_steps > 1 and x_payload_bytes < 512 * 1024:
        # Small per-step DMA: 3-deep buffering hides latency the default
        # double-buffer pipeline can't fully cover.
        x_spec = pl.BlockSpec(x_block, x_index, pipeline_mode=pl.Buffered(3))
    else:
        x_spec = pl.BlockSpec(x_block, x_index)

    kernel = functools.partial(mlp1_kernel, x_transposed=x_transposed)

    out_row = pl.pallas_call(
        kernel,
        out_shape=jax.ShapeDtypeStruct((1, N), jnp.float32),
        grid_spec=pltpu.PrefetchScalarGridSpec(
            num_scalar_prefetch=0,
            grid=(n_steps,),
            in_specs=[
                x_spec,                                             # x block
                pl.BlockSpec((hid, in_f), lambda i: (0, 0)),        # W1 (resident)
                pl.BlockSpec((hid, 1), lambda i: (0, 0)),           # b1 column
                pl.BlockSpec((hid, 1), lambda i: (0, 0)),           # W2 column
                pl.BlockSpec(memory_space=pltpu.MemorySpace.SMEM),  # b2 scalar
            ],
            out_specs=pl.BlockSpec((1, tile_m), lambda i: (0, i)),  # lane-dense
        ),
        compiler_params=pltpu.CompilerParams(
            dimension_semantics=("parallel",),
            vmem_limit_bytes=vmem_limit),
    )(x_in, w1_r, b1_c, w2_c, b2_s)

    return out_row.reshape(N, 1)


if __name__ == "__main__":
    key = jax.random.PRNGKey(0)
    k_x, k_w1, k_b1, k_w2, k_b2 = jax.random.split(key, 5)

    N = 8            # batch
    input_size = 4   # number of features
    hidden_size = 32

    x = jax.random.normal(k_x, (N, input_size), dtype=jnp.float32)

    # Deterministic parameter init (matches torch nn.Linear shapes).
    bound1 = 1.0 / jnp.sqrt(input_size)
    w1 = jax.random.uniform(k_w1, (hidden_size, input_size),
                            minval=-bound1, maxval=bound1, dtype=jnp.float32)
    b1 = jax.random.uniform(k_b1, (hidden_size,),
                            minval=-bound1, maxval=bound1, dtype=jnp.float32)
    bound2 = 1.0 / jnp.sqrt(hidden_size)
    w2 = jax.random.uniform(k_w2, (1, hidden_size),
                            minval=-bound2, maxval=bound2, dtype=jnp.float32)
    b2 = jax.random.uniform(k_b2, (1,),
                            minval=-bound2, maxval=bound2, dtype=jnp.float32)

    out = mlp1_forward(x, w1, b1, w2, b2)
    out = jax.block_until_ready(out)

    # Reference check in plain JAX (same math as the torch forward).
    ref = jnp.tanh(x @ w1.T + b1) @ w2.T + b2
    assert out.shape == (N, 1)
    assert jnp.allclose(out, ref, atol=1e-5, rtol=1e-5)

    print("KERNEL_OK")
</pallas_src>

<mosaic_0001>
module attributes {stable_mosaic.version = 11 : i64} {
  func.func @mlp1_kernel(%arg0: i32, %arg1: memref<4x8xf32, #tpu.memory_space<vmem>>, %arg2: memref<32x4xf32, #tpu.memory_space<vmem>>, %arg3: memref<32x1xf32, #tpu.memory_space<vmem>>, %arg4: memref<32x1xf32, #tpu.memory_space<vmem>>, %arg5: memref<1xf32, #tpu.memory_space<smem>>, %arg6: memref<1x8xf32, #tpu.memory_space<vmem>>) attributes {dimension_semantics = [#tpu.dimension_semantics<parallel>], iteration_bounds = array<i64: 1>, scalar_prefetch = 0 : i64, scratch_operands = 0 : i64, tpu.core_type = #tpu.core_type<tc>, window_params = [{transform_indices = @transform_0, window_bounds = array<i64: 4, 8>}, {pipeline_mode = #tpu.pipeline_mode<synchronous>, transform_indices = @transform_1, window_bounds = array<i64: 32, 4>}, {pipeline_mode = #tpu.pipeline_mode<synchronous>, transform_indices = @transform_2, window_bounds = array<i64: 32, 1>}, {pipeline_mode = #tpu.pipeline_mode<synchronous>, transform_indices = @transform_3, window_bounds = array<i64: 32, 1>}, {transform_indices = @transform_4, window_bounds = array<i64: 1>}, {transform_indices = @transform_5, window_bounds = array<i64: 1, 8>}]} {
    %c0 = arith.constant 0 : index
    %c0_0 = arith.constant 0 : index
    %0 = vector.load %arg2[%c0, %c0_0] : memref<32x4xf32, #tpu.memory_space<vmem>>, vector<32x4xf32>
    %c0_1 = arith.constant 0 : index
    %c0_2 = arith.constant 0 : index
    %1 = vector.load %arg1[%c0_1, %c0_2] : memref<4x8xf32, #tpu.memory_space<vmem>>, vector<4x8xf32>
    %cst = arith.constant dense<0.000000e+00> : vector<32x8xf32>
    %2 = tpu.matmul %0, %1, %cst {dimension_numbers = #tpu.dot_dimension_numbers<[1], [0], [0], [1], [0, 0, 1, 1], [], []>} : vector<32x4xf32>, vector<4x8xf32>, vector<32x8xf32> -> vector<32x8xf32>
    %c0_3 = arith.constant 0 : index
    %c0_4 = arith.constant 0 : index
    %3 = vector.load %arg3[%c0_3, %c0_4] : memref<32x1xf32, #tpu.memory_space<vmem>>, vector<32x1xf32>
    %4 = vector.broadcast %3 : vector<32x1xf32> to vector<32x8xf32>
    %5 = arith.addf %2, %4 : vector<32x8xf32>
    %6 = math.tanh %5 : vector<32x8xf32>
    %c0_5 = arith.constant 0 : index
    %c0_6 = arith.constant 0 : index
    %7 = vector.load %arg4[%c0_5, %c0_6] : memref<32x1xf32, #tpu.memory_space<vmem>>, vector<32x1xf32>
    %8 = vector.broadcast %7 : vector<32x1xf32> to vector<32x8xf32>
    %9 = arith.mulf %6, %8 : vector<32x8xf32>
    %cst_7 = arith.constant dense<0.000000e+00> : vector<8xf32>
    %10 = vector.multi_reduction <add>, %9, %cst_7 [0] : vector<32x8xf32> to vector<8xf32>
    %11 = vector.shape_cast %10 : vector<8xf32> to vector<1x8xf32>
    %c0_8 = arith.constant 0 : index
    %12 = memref.load %arg5[%c0_8] : memref<1xf32, #tpu.memory_space<smem>>
    %13 = vector.broadcast %12 : f32 to vector<1x8xf32>
    %14 = arith.addf %11, %13 : vector<1x8xf32>
    %c0_9 = arith.constant 0 : index
    %c0_10 = arith.constant 0 : index
    %15 = vector.load %arg6[%c0_9, %c0_10] : memref<1x8xf32, #tpu.memory_space<vmem>>, vector<1x8xf32>
    tpu.vector_store %arg6[%c0_9, %c0_10], %14 {strides = array<i32>} : memref<1x8xf32, #tpu.memory_space<vmem>>, vector<1x8xf32>,
    return
  }
  func.func @transform_0(%arg0: i32) -> (i32, i32) {
    %c0_i32 = arith.constant 0 : i32
    %c0_i32_0 = arith.constant 0 : i32
    return %c0_i32, %arg0 : i32, i32
  }
  func.func @transform_1(%arg0: i32) -> (i32, i32) {
    %c0_i32 = arith.constant 0 : i32
    %c0_i32_0 = arith.constant 0 : i32
    %c0_i32_1 = arith.constant 0 : i32
    return %c0_i32, %c0_i32_0 : i32, i32
  }
  func.func @transform_2(%arg0: i32) -> (i32, i32) {
    %c0_i32 = arith.constant 0 : i32
    %c0_i32_0 = arith.constant 0 : i32
    %c0_i32_1 = arith.constant 0 : i32
    return %c0_i32, %c0_i32_0 : i32, i32
  }
  func.func @transform_3(%arg0: i32) -> (i32, i32) {
    %c0_i32 = arith.constant 0 : i32
    %c0_i32_0 = arith.constant 0 : i32
    %c0_i32_1 = arith.constant 0 : i32
    return %c0_i32, %c0_i32_0 : i32, i32
  }
  func.func @transform_4(%arg0: i32) -> i32 {
    %c0_i32 = arith.constant 0 : i32
    %c0_i32_0 = arith.constant 0 : i32
    return %c0_i32 : i32
  }
  func.func @transform_5(%arg0: i32) -> (i32, i32) {
    %c0_i32 = arith.constant 0 : i32
    %c0_i32_0 = arith.constant 0 : i32
    return %c0_i32, %arg0 : i32, i32
  }
}

</mosaic_0001>

<bundles_post_ra>
// kernel: tpu_custom_call.1
= control target key start
LH: loop header
LB: loop body
LE: loop exit
PB: predicated region body
PF: predicated region fallthrough
CT: control target
= control target key end

     0   :  { %vm64_vm0 = vcmask 1043456   ;;  %vm51_vm1 = vcmask 31744   ;;  %s360_s0 = inlined_call_operand.vmem [shape: f32[4,8], index: 0, kind: input, shape index: {}]   ;;  %s361_s1 = inlined_call_operand.vmem [shape: f32[32,4], index: 1, kind: input, shape index: {}]   ;;  %s362_s2 = inlined_call_operand.vmem [shape: f32[32,1], index: 2, kind: input, shape index: {}]   ;;  %s363_s3 = inlined_call_operand.vmem [shape: f32[32,1], index: 3, kind: input, shape index: {}]   ;;  %s364_s4 = inlined_call_operand.<no memory space> [shape: f32[1], index: 4, kind: input, shape index: {}]   ;;  %s365_s5 = inlined_call_operand.hbm [shape: f32[1,8], index: 5, kind: output, shape index: {}]  }
   0x1   :  { %v26_v0 = vld [vmem:[%s360_s0] sm:$0xf]  ;;  %v24_v2 = vld [vmem:[%s361_s1 + $0x10] sm:$0xff]  ;;  %v23_v3 = vld [vmem:[%s361_s1 + $0x8] sm:$0xff] }
   0x2   :  { %v22_v1 = vld [vmem:[%s361_s1] sm:$0xff]  ;;  %228 = vmatprep.subr.msk.mxu0 %vm64_vm0, %v26_v0  ;;  %236 = vmatprep.subr.msk.mxu1 %vm64_vm0, %v26_v0  ;;  %v25_v4 = vld [vmem:[%s361_s1 + $0x18] sm:$0xff]  ;;  %v29_v6 = vld [vmem:[%s362_s2 + $0x10] sm:$0xff] }
   0x3   :  { %229 = vmatpush3.msk.msra.mxu0 %vm64_vm0, %v26_v0  ;;  %237 = vmatpush3.msk.msra.mxu1 %vm64_vm0, %v26_v0  ;;  %v27_v5 = vld [vmem:[%s362_s2] sm:$0xff] }
   0x4   :  { %230 = vmatprep.mubr.msk.f32.mxu0 %vm51_vm1, %v22_v1  ;;  %233 = vmatprep.mubr.msk.f32.mxu1 %vm51_vm1, %v24_v2 }
   0x5   :  { %231 = vmatmul.mubr.msk.f32.vlgmr.msra.gmra.mrb[0].mxu0 %vm51_vm1, %v23_v3  ;;  %234 = vmatmul.mubr.msk.f32.vlgmr.msra.gmra.mrb[0].mxu1 %vm51_vm1, %v25_v4 }
   0x6   :  { %11 = vsyncpa [#allocation4], 0  ;;  %v274_v7 = vmov 0   ;;  %v28_v8 = vld [vmem:[%s362_s2 + $0x8] sm:$0xff]  ;;  %v30_v9 = vld [vmem:[%s362_s2 + $0x18] sm:$0xff]  ;;  %vm185_vm2 = vcmask 64512   ;;  %v200_v50 = vstv %s364_s4 }
   0x7   :  { %240 = vset.pattern.permute.xlu0 %v274_v7  ;;  %241 = vset.pattern.permute.xlu1 %v274_v7  ;;  %v157_v10 = vld [vmem:[%s363_s3] sm:$0xff]  ;;  %v158_v11 = vld [vmem:[%s363_s3 + $0x8] sm:$0xff]  ;;  %v159_v12 = vld [vmem:[%s363_s3 + $0x10] sm:$0xff]  ;;  %s275_s17 = smov [#allocation3]   ;;  %vm202_vm3 = vcmask 57344  }
   0x8   :  { %33 = vperm.xlu0 %240, %v27_v5   ;;  %43 = vperm.xlu1 %241, %v29_v6   ;;  %v160_v13 = vld [vmem:[%s363_s3 + $0x18] sm:$0xff]  ;;  %s210_s18 = sshll.u32 %s275_s17, 4  ;;  %s211_s18 = int_to_ptr.vmem [resolvable:$true] %s210_s18 }
   0x9   :  { %s250_s19 = scalar_lea.vmem %s211_s18, 16  ;;  %s254_s20 = scalar_lea.vmem %s211_s18, 32 }
   0xa   :  { %p251_p0 = scmp.ne.s32.totalorder %s211_s18, %s250_s19  ;;  %p255_p1 = scmp.lt.s32.totalorder %s211_s18, %s211_s18 }
   0xb   :  { %p256_p2 = scmp.lt.s32.totalorder %s254_s20, %s250_s19 }
   0xc   :  { %38 = vperm.xlu0 %240, %v28_v8   ;;  %48 = vperm.xlu1 %241, %v30_v9  }
   0xd   :  { %p257_p3 = por %p256_p2, %p255_p1 }
   0xf   :  { %p258_p4 = pnand %p257_p3, %p251_p0 }
  0x10   :  { %163 = vperm.xlu0 %240, %v157_v10   ;;  %168 = vperm.xlu1 %241, %v158_v11  }
  0x14   :  { %173 = vperm.xlu0 %240, %v159_v12   ;;  %178 = vperm.xlu1 %241, %v160_v13  }
  0x87   :  { %v34_v14 = vpop.permute.xlu0 %33  ;;  %v44_v15 = vpop.permute.xlu1 %43 }
  0x8b   :  { %v39_v16 = vpop.permute.xlu0 %38  ;;  %v49_v17 = vpop.permute.xlu1 %48 }
  0x8f   :  { %v164_v26 = vpop.permute.xlu0 %163  ;;  %v169_v27 = vpop.permute.xlu1 %168 }
  0x93   :  { %v174_v33 = vpop.permute.xlu0 %173  ;;  %v179_v36 = vpop.permute.xlu1 %178 }
  0xd8   :  { %v232_v18 = vpop.f32.mrb[0].mxu0  ;;  %v235_v19 = vpop.f32.mrb[0].mxu1 }
  0xd9   :  { %v140_v20 = vadd.f32 %v232_v18, %v39_v16  ;;  %v150_v21 = vadd.f32 %v235_v19, %v49_v17  ;;  %v134_v22 = vpop.f32.mrb[1].mxu0  ;;  %v144_v23 = vpop.f32.mrb[1].mxu1 }
  0xda   :  { %v135_v24 = vadd.f32 %v134_v22, %v34_v14  ;;  %v145_v25 = vadd.f32 %v144_v23, %v44_v15 }
  0xdb   :  { %242 = vtanh.f32 %v140_v20 }
  0xdc   :  { %244 = vtanh.f32 %v150_v21 }
  0xdd   :  { %246 = vtanh.f32 %v135_v24 }
  0xde   :  { %248 = vtanh.f32 %v145_v25 }
  0xe5   :  { %v243_v28 = vpop.eup %242 }
  0xe6   :  { %v245_v29 = vpop.eup %244  ;;  %v182_v30 = vmul.f32 %v243_v28, %v169_v27 }
  0xe7   :  { %v247_v31 = vpop.eup %246  ;;  %v184_v38 = vmul.f32 %v245_v29, %v179_v36 }
  0xe8   :  { %v249_v32 = vpop.eup %248  ;;  %v187_v34 = vsel %vm185_vm2, %v182_v30, 0.0  ;;  %v181_v35 = vmul.f32 %v247_v31, %v164_v26 }
  0xe9   :  { %v183_v37 = vmul.f32 %v249_v32, %v174_v33  ;;  %v191_v43 = vsel %vm185_vm2, %v184_v38, 0.0 }
  0xea   :  { %v186_v39 = vsel %vm185_vm2, %v181_v35, 0.0 }
  0xeb   :  { %v188_v40 = vadd.f32 %v187_v34, %v186_v39  ;;  %v189_v41 = vsel %vm185_vm2, %v183_v37, 0.0 }
  0xed   :  { %v190_v42 = vadd.f32 %v189_v41, %v188_v40 }
  0xef   :  { %v192_v44 = vadd.f32 %v191_v43, %v190_v42 }
  0xf1   :  { %v193_v45 = vrot.slane %v192_v44, 4 }
  0xf3   :  { %v194_v46 = vadd.f32 %v193_v45, %v192_v44 }
  0xf5   :  { %v195_v47 = vrot.slane %v194_v46, 2 }
  0xf7   :  { %v196_v48 = vadd.f32 %v195_v47, %v194_v46 }
  0xf9   :  { %v197_v49 = vrot.slane %v196_v48, 1 }
  0xfb   :  { %v198_v51 = vadd.f32 %v197_v49, %v196_v48 }
  0xfd   :  { %v201_v52 = vadd.f32 %v200_v50, %v198_v51 }
  0xff   :  { %203 = vst.msk [vmem:[#allocation3] sm:$0x1] %vm202_vm3, %v201_v52 }
 0x100   :  { %261 = shalt.err (!%p258_p4)
}
 0x101   :  { %s262_s23 = scalar_lea.hbm %s365_s5, 16 }
 0x102   :  { %p263_p5 = scmp.ne.s32.totalorder %s365_s5, %s262_s23  ;;  %p266_p6 = scmp.lt.u32.totalorder %s262_s23, %s365_s5 }
 0x104   :  { %p268_p7 = pnand %p266_p6, %p263_p5 }
 0x106   :  { %271 = shalt.err (!%p268_p7)
}
 0x107   :  { %213 = dma.vmem_to_hbm [thread:$0]  %s211_s18, 16, %s365_s5, [#allocation4]  }
 0x108   :  { %272 = dma.done.wait [#allocation4], 16  }
 0x109   :  { %273 = vsyncadd [#allocation4], 4294967280 }
 0x10a   :  { %217 = vsyncpa [#allocation4], 1 }

</bundles_post_ra>
